<compile_context>
chip_gen: v6e
topology: v6e:2x2x1
jax: 0.10.0
libtpu: 0.0.40
codegen_flags: <defaults>
</compile_context>

<pallas_src>
import math

import numpy as np
import jax
import jax.numpy as jnp
from jax import lax
from jax.experimental import pallas as pl
from jax.experimental.pallas import tpu as pltpu


# ----------------------------------------------------------------------------
# Kernel: one (batch, channel-block) step.
# ----------------------------------------------------------------------------
def _aa_kernel(x_ref, bb_ref, a_ref, o_ref):
    """out = (I_Cb (x) Bt) @ x_flat @ A   (pad + blur + subsample, both axes).

    x_ref : (1, Cb*H, W)        flattened input channel block (lane axis = W)
    bb_ref: (Cb*Hout, Cb*H)     block-diagonal vertical blur+subsample (bf16)
    a_ref : (W, Wout)           horizontal blur+subsample (bf16)
    o_ref : (1, Cb*Hout, Wout)  flattened output channel block
    """
    x = x_ref[0].astype(jnp.bfloat16)                         # (Cb*H, W)
    # Vertical pass first keeps the intermediate lane-dense (last dim = W).
    tmp = jnp.dot(bb_ref[...], x,
                  preferred_element_type=jnp.float32)         # (Cb*Hout, W) f32
    out = jnp.dot(tmp.astype(jnp.bfloat16), a_ref[...],
                  preferred_element_type=jnp.float32)         # (Cb*Hout, Wout)
    o_ref[0] = out.astype(o_ref.dtype)


# ----------------------------------------------------------------------------
# Trace-time construction of the Gaussian resampling matrices.
# ----------------------------------------------------------------------------
def _gaussian_1d(scale):
    """Normalized 1-D Gaussian factor; outer(g, g) == the module's 2-D kernel."""
    sigma = (1.0 / scale - 1.0) / 2.0
    ksize = 2 * round(sigma * 4) + 1
    ka = ksize // 2
    t = np.arange(ksize, dtype=np.float64)
    mean = (ksize - 1) / 2.0
    if ksize > 1:
        g = np.exp(-((t - mean) ** 2) / (2.0 * sigma ** 2))
    else:
        g = np.ones((1,), dtype=np.float64)
    return g / g.sum(), ka, ksize


def _resample_matrix(g, ka, ksize, in_size, out_size, scale):
    """M[h, j] = g[h + ka - src(j)] inside the kernel support, else 0.

    src(j) = floor(j / scale) is PyTorch's nearest source index when a
    scale_factor is passed to F.interpolate. Zero padding of the input is
    implicit (out-of-range taps are simply dropped from the matrix).
    """
    src = np.minimum(np.floor(np.arange(out_size) / scale),
                     in_size - 1).astype(np.int64)
    idx = np.arange(in_size)[:, None] + ka - src[None, :]
    valid = (idx >= 0) & (idx < ksize)
    return np.where(valid, g[np.clip(idx, 0, ksize - 1)], 0.0)   # (in, out)


def _pick_channel_block(C, H, W, Hout, Wout, itemsize):
    """Largest channel block (divisor of C) that keeps VMEM comfortable and
    sublane-aligned, so the kernel also fits v7x's smaller VMEM."""
    budget = 24 << 20  # stay well under the 32 MiB default scoped VMEM limit
    cands = [cb for cb in range(1, C + 1)
             if C % cb == 0
             and (cb == C or ((cb * H) % 16 == 0 and (cb * Hout) % 16 == 0))]

    def vmem_bytes(cb):
        return (2 * cb * H * W * itemsize            # double-buffered input
                + 2 * cb * Hout * Wout * itemsize    # double-buffered output
                + 2 * (cb * Hout) * (cb * H) * 2     # bf16 kron weights
                + 2 * W * Wout * 2                   # bf16 A
                + 4 * cb * Hout * (W + Wout))        # f32 intermediates

    fitting = [cb for cb in cands if vmem_bytes(cb) <= budget]
    return max(fitting) if fitting else min(cands)


# ----------------------------------------------------------------------------
# Public wrapper == AntiAliasInterpolation2d(channels=x.shape[1], scale)(x).
# ----------------------------------------------------------------------------
def antialias_interpolation2d(x, scale):
    if scale == 1.0:
        return x

    N, C, H, W = x.shape
    g, ka, ksize = _gaussian_1d(scale)
    Hout = int(math.floor(H * scale))
    Wout = int(math.floor(W * scale))

    a_np = _resample_matrix(g, ka, ksize, W, Wout, scale)       # (W, Wout)
    bt_np = _resample_matrix(g, ka, ksize, H, Hout, scale).T    # (Hout, H)

    itemsize = jnp.dtype(x.dtype).itemsize
    Cb = _pick_channel_block(C, H, W, Hout, Wout, itemsize)
    n_cblk = C // Cb

    # Block-diagonal (I_Cb (x) Bt): the vertical pass for all Cb channels is a
    # single fat-M 2-D MXU matmul (M = Cb*Hout instead of Hout), no transposes.
    bb_np = np.kron(np.eye(Cb), bt_np)                          # (Cb*Hout, Cb*H)

    # MXU operands in bf16 (native on v5e/v6e/v7x); accumulation stays f32.
    a_mat = jnp.asarray(a_np, dtype=jnp.bfloat16)
    bb_mat = jnp.asarray(bb_np, dtype=jnp.bfloat16)

    # NCHW is contiguous over (c, h, w): this reshape is a free metadata op and
    # lets each grid step DMA one fat, contiguous, lane-dense slab.
    x_flat = x.reshape(N, C * H, W)

    cost = pl.CostEstimate(
        flops=2 * N * n_cblk * ((Cb * Hout) * (Cb * H) * W
                                + (Cb * Hout) * W * Wout),
        transcendentals=0,
        bytes_accessed=(N * C * (H * W + Hout * Wout)) * itemsize
        + (bb_np.size + a_np.size) * 2,
    )

    out_flat = pl.pallas_call(
        _aa_kernel,
        out_shape=jax.ShapeDtypeStruct((N, C * Hout, Wout), x.dtype),
        grid_spec=pltpu.PrefetchScalarGridSpec(
            num_scalar_prefetch=0,
            grid=(N, n_cblk),
            in_specs=[
                pl.BlockSpec((1, Cb * H, W), lambda n, c: (n, c, 0)),
                # Weight matrices: constant block index -> fetched once,
                # resident across the whole grid.
                pl.BlockSpec((Cb * Hout, Cb * H), lambda n, c: (0, 0)),
                pl.BlockSpec((W, Wout), lambda n, c: (0, 0)),
            ],
            out_specs=pl.BlockSpec((1, Cb * Hout, Wout), lambda n, c: (n, c, 0)),
        ),
        compiler_params=pltpu.CompilerParams(
            dimension_semantics=("parallel", "parallel")),
        cost_estimate=cost,
    )(x_flat, bb_mat, a_mat)

    # Free metadata reshape back to NCHW.
    return out_flat.reshape(N, C, Hout, Wout)


# ----------------------------------------------------------------------------
# Pure-JAX reference: literal pad -> depthwise conv -> nearest subsample (f32).
# ----------------------------------------------------------------------------
def antialias_reference(x, scale):
    if scale == 1.0:
        return x
    N, C, H, W = x.shape
    g, ka, ksize = _gaussian_1d(scale)
    k2d = np.outer(g, g)
    k2d = k2d / k2d.sum()

    w = jnp.broadcast_to(jnp.asarray(k2d, jnp.float32), (C, 1, ksize, ksize))
    xp = jnp.pad(x.astype(jnp.float32), ((0, 0), (0, 0), (ka, ka), (ka, ka)))
    conv = lax.conv_general_dilated(
        xp, w, window_strides=(1, 1), padding="VALID",
        dimension_numbers=("NCHW", "OIHW", "NCHW"), feature_group_count=C)

    Hout = int(math.floor(H * scale))
    Wout = int(math.floor(W * scale))
    si = np.minimum(np.floor(np.arange(Hout) / scale), H - 1).astype(np.int32)
    sj = np.minimum(np.floor(np.arange(Wout) / scale), W - 1).astype(np.int32)
    out = conv[:, :, si, :][:, :, :, sj]
    return out.astype(x.dtype)


if __name__ == "__main__":
    # Small shapes consistent with the module: batch=2, channels=4, 16x16 input,
    # scale=0.25 (typical FOMM usage -> sigma=1.5, 13x13 Gaussian, 4x4 output).
    N, C, H, W = 2, 4, 16, 16
    scale = 0.25

    key = jax.random.PRNGKey(0)
    x = jax.random.normal(key, (N, C, H, W), dtype=jnp.float32)

    out = antialias_interpolation2d(x, scale)
    out = jax.block_until_ready(out)

    ref = antialias_reference(x, scale)
    assert out.shape == (N, C, int(H * scale), int(W * scale)), out.shape
    # MXU runs with bf16 operands (f32 accumulation), so compare with a
    # correspondingly relaxed tolerance against the exact-f32 reference.
    max_err = float(jnp.max(jnp.abs(out.astype(jnp.float32) - ref.astype(jnp.float32))))
    assert jnp.allclose(out, ref, atol=3e-2, rtol=3e-2), max_err

    print("KERNEL_OK")
</pallas_src>

<mosaic_0001>
module attributes {stable_mosaic.version = 11 : i64} {
  func.func @_aa_kernel(%arg0: i32, %arg1: i32, %arg2: memref<1x64x16xf32, #tpu.memory_space<vmem>>, %arg3: memref<16x64xbf16, #tpu.memory_space<vmem>>, %arg4: memref<16x4xbf16, #tpu.memory_space<vmem>>, %arg5: memref<1x16x4xf32, #tpu.memory_space<vmem>>) attributes {dimension_semantics = [#tpu.dimension_semantics<parallel>, #tpu.dimension_semantics<parallel>], iteration_bounds = array<i64: 2, 1>, scalar_prefetch = 0 : i64, scratch_operands = 0 : i64, tpu.core_type = #tpu.core_type<tc>, window_params = [{transform_indices = @transform_0, window_bounds = array<i64: 1, 64, 16>}, {pipeline_mode = #tpu.pipeline_mode<synchronous>, transform_indices = @transform_1, window_bounds = array<i64: 16, 64>}, {pipeline_mode = #tpu.pipeline_mode<synchronous>, transform_indices = @transform_2, window_bounds = array<i64: 16, 4>}, {transform_indices = @transform_3, window_bounds = array<i64: 1, 16, 4>}]} {
    %c0 = arith.constant 0 : index
    %c0_0 = arith.constant 0 : index
    %c0_1 = arith.constant 0 : index
    %0 = vector.load %arg2[%c0, %c0_0, %c0_1] : memref<1x64x16xf32, #tpu.memory_space<vmem>>, vector<1x64x16xf32>
    %1 = vector.shape_cast %0 : vector<1x64x16xf32> to vector<64x16xf32>
    %2 = arith.truncf %1 : vector<64x16xf32> to vector<64x16xbf16>
    %c0_2 = arith.constant 0 : index
    %c0_3 = arith.constant 0 : index
    %3 = vector.load %arg3[%c0_2, %c0_3] : memref<16x64xbf16, #tpu.memory_space<vmem>>, vector<16x64xbf16>
    %cst = arith.constant dense<0.000000e+00> : vector<16x16xf32>
    %4 = tpu.matmul %3, %2, %cst {dimension_numbers = #tpu.dot_dimension_numbers<[1], [0], [0], [1], [0, 0, 1, 1], [], []>} : vector<16x64xbf16>, vector<64x16xbf16>, vector<16x16xf32> -> vector<16x16xf32>
    %5 = arith.truncf %4 : vector<16x16xf32> to vector<16x16xbf16>
    %c0_4 = arith.constant 0 : index
    %c0_5 = arith.constant 0 : index
    %6 = vector.load %arg4[%c0_4, %c0_5] : memref<16x4xbf16, #tpu.memory_space<vmem>>, vector<16x4xbf16>
    %cst_6 = arith.constant dense<0.000000e+00> : vector<16x4xf32>
    %7 = tpu.matmul %5, %6, %cst_6 {dimension_numbers = #tpu.dot_dimension_numbers<[1], [0], [0], [1], [0, 0, 1, 1], [], []>} : vector<16x16xbf16>, vector<16x4xbf16>, vector<16x4xf32> -> vector<16x4xf32>
    %c0_7 = arith.constant 0 : index
    %c0_8 = arith.constant 0 : index
    %c0_9 = arith.constant 0 : index
    %8 = vector.load %arg5[%c0_7, %c0_8, %c0_9] : memref<1x16x4xf32, #tpu.memory_space<vmem>>, vector<1x16x4xf32>
    %9 = vector.shape_cast %8 : vector<1x16x4xf32> to vector<16x4xf32>
    %10 = vector.shape_cast %7 : vector<16x4xf32> to vector<1x16x4xf32>
    tpu.vector_store %arg5[%c0_7, %c0_8, %c0_9], %10 {strides = array<i32>} : memref<1x16x4xf32, #tpu.memory_space<vmem>>, vector<1x16x4xf32>,
    return
  }
  func.func @transform_0(%arg0: i32, %arg1: i32) -> (i32, i32, i32) {
    %c0_i32 = arith.constant 0 : i32
    %c0_i32_0 = arith.constant 0 : i32
    return %arg0, %arg1, %c0_i32 : i32, i32, i32
  }
  func.func @transform_1(%arg0: i32, %arg1: i32) -> (i32, i32) {
    %c0_i32 = arith.constant 0 : i32
    %c0_i32_0 = arith.constant 0 : i32
    %c0_i32_1 = arith.constant 0 : i32
    return %c0_i32, %c0_i32_0 : i32, i32
  }
  func.func @transform_2(%arg0: i32, %arg1: i32) -> (i32, i32) {
    %c0_i32 = arith.constant 0 : i32
    %c0_i32_0 = arith.constant 0 : i32
    %c0_i32_1 = arith.constant 0 : i32
    return %c0_i32, %c0_i32_0 : i32, i32
  }
  func.func @transform_3(%arg0: i32, %arg1: i32) -> (i32, i32, i32) {
    %c0_i32 = arith.constant 0 : i32
    %c0_i32_0 = arith.constant 0 : i32
    return %arg0, %arg1, %c0_i32 : i32, i32, i32
  }
}

</mosaic_0001>

<bundles_post_ra>
// kernel: tpu_custom_call.1
= control target key start
LH: loop header
LB: loop body
LE: loop exit
PB: predicated region body
PF: predicated region fallthrough
CT: control target
= control target key end

     0   :  { %s535_s12 = smov 0   ;;  %s537_s13 = smov 0   ;;  %s578_s0 = inlined_call_operand.vmem [shape: f32[2,64,16], index: 0, kind: input, shape index: {}]   ;;  %s579_s1 = inlined_call_operand.vmem [shape: bf16[16,64], index: 1, kind: input, shape index: {}]   ;;  %s580_s2 = inlined_call_operand.vmem [shape: bf16[16,4], index: 2, kind: input, shape index: {}]   ;;  %s581_s3 = inlined_call_operand.vmem [shape: f32[2,16,4], index: 3, kind: output, shape index: {}]  }
   0x1   :  { %s539_s14 = smov 0  }
   0x2 LB: > { %s25_s15 = sadd.s32 1, %s507_s13  ;;  %p423_p0 = scmp.ge.s32.totalorder %s511_s14, 1  ;;  %s511_s14 = sphi %s539_s14, %s13_s14   ;;  %s507_s13 = sphi %s537_s13, %s583_s13   ;;  %s503_s12 = sphi %s535_s12, %s582_s12  }
   0x3   : > { %p27_p1 = scmp.ge.s32.totalorder %s25_s15, 2  ;;  %p158_p2 = scmp.lt.s32.totalorder %s511_s14, 3 }
   0x5   : > { %s585_s15 = smov (%p27_p1, %s25_s15), 0  ;;  %p159_p3 = pnand %p423_p0, %p158_p2 }
   0x6   : > { %p191_p4 = scmp.lt.s32.totalorder (!%p159_p3), %s503_s12, 1 }
   0x7   : > { %162 = sbr.rel (%p159_p3) target bundleno = 431 (0x1af), region = 32 }
   0xc   : > { %v513_v0 = vmov 0.0   ;;  %vm514_vm0 = vmmov 0   ;;  %s587_s12 = smov (!%p191_p4, %s503_s12), 1  ;;  %v487_v13 = vld [vmem:[%s579_s1] sm:$0xff]   ;;  %vm230_vm1 = vcmask 523264   ;;  %vm284_vm2 = vcmask 130048  }
   0xd   : > { %443 = vmatprep.subr.bf16.mxu0 %v513_v0  ;;  %451 = vmatprep.mubr.msk.bf16.mxu0 %vm514_vm0, %v513_v0  ;;  %s434_s16 = sshll.u32 %s587_s12, 6  ;;  %v488_v14 = vld [vmem:[%s580_s2] sm:$0xff]   ;;  %s435_s24 = sshll.u32 %s587_s12, 4  ;;  %vm329_vm3 = vcmask 31744  }
   0xe   : > { %455 = vmatprep.subr.bf16.mxu1 %v513_v0  ;;  %457 = vmatprep.mubr.msk.bf16.mxu1 %vm514_vm0, %v513_v0  ;;  %s198_s19 = scalar_lea.vmem %s578_s0, %s434_s16  ;;  %s208_s27 = scalar_lea.vmem %s581_s3, %s435_s24 }
   0xf   : > { %v217_v1 = vld [vmem:[%s198_s19 + $0x30] sm:$0xff]  ;;  %v218_v2 = vld [vmem:[%s198_s19 + $0x38] sm:$0xff]  ;;  %v215_v3 = vld [vmem:[%s198_s19 + $0x20] sm:$0xff]  ;;  %456 = vmatpush3.bf16.msra.mxu1 %v488_v14 }
  0x10   : > { %v222_v4 = vpack.c.bf16 %v218_v2, %v217_v1  ;;  %v216_v5 = vld [vmem:[%s198_s19 + $0x28] sm:$0xff]  ;;  %v213_v7 = vld [vmem:[%s198_s19 + $0x10] sm:$0xff]  ;;  %v214_v8 = vld [vmem:[%s198_s19 + $0x18] sm:$0xff] }
  0x11   : > { %v221_v6 = vpack.c.bf16 %v216_v5, %v215_v3  ;;  %v220_v9 = vpack.c.bf16 %v214_v8, %v213_v7  ;;  %v211_v10 = vld [vmem:[%s198_s19] sm:$0xff]  ;;  %v212_v11 = vld [vmem:[%s198_s19 + $0x8] sm:$0xff] }
  0x12   : > { %444 = vmatpush3.bf16.msra.mxu0 %v222_v4  ;;  %v219_v12 = vpack.c.bf16 %v212_v11, %v211_v10 }
  0x13   : > { %445 = vmatprep.subr.bf16.mxu0 %v513_v0 }
  0x16   : > { %446 = vmatpush3.bf16.msra.mxu0 %v221_v6 }
  0x17   : > { %447 = vmatprep.subr.bf16.mxu0 %v513_v0 }
  0x1a   : > { %448 = vmatpush3.bf16.msra.mxu0 %v220_v9 }
  0x1b   : > { %449 = vmatprep.subr.bf16.mxu0 %v513_v0 }
  0x1e   : > { %450 = vmatpush3.bf16.msra.mxu0 %v219_v12 }
  0x21   : > { %452 = vmatmul.mubr.msk.bf16.vlgmr.msra.gmra.mxu0 %vm230_vm1, %v487_v13 }
  0xe1   : > { %v268_v15 = vpop.f32.mrf.mxu0 }
  0xe3   : > { %v453_v16 = vpop.f32.mrf.mxu0 }
  0xe5   : > { %v271_v17 = vpop.f32.mrf.mxu0 }
  0xe6   : > { %v275_v18 = vpack.c.bf16 %v271_v17, %v268_v15 }
  0xe7   : > { %v454_v19 = vpop.f32.mrf.mxu0 }
  0xe8   : > { %458 = vmatmul.mubr.msk.bf16.vlgmr.msra.gmra.mxu1 %vm284_vm2, %v275_v18 }
 0x1a8   : > { %v322_v20 = vpop.f32.mrf.mxu1 }
 0x1a9   : > { %330 = vst.msk [vmem:[%s208_s27] sm:$0xff] %vm329_vm3, %v322_v20 }
 0x1aa   : > { %v459_v21 = vpop.f32.mrf.mxu1 }
 0x1ac   : > { %v325_v22 = vpop.f32.mrf.mxu1 }
 0x1ad   : > { %331 = vst.msk [vmem:[%s208_s27 + $0x8] sm:$0xff] %vm329_vm3, %v325_v22 }
 0x1ae   : > { %v460_v23 = vpop.f32.mrf.mxu1 }
 0x1af PF: > { %s13_s14 = sadd.s32 1, %s511_s14   ;;  %s582_s12 = smov %s507_s13 }
 0x1b0   : > { %p10_p5 = scmp.ge.s32.totalorder %s13_s14, 4   ;;  %s583_s13 = smov %s585_s15 }
 0x1b2   :  { %12 = sbr.rel (!%p10_p5) target bundleno = 2 (0x2), region = 62 }

</bundles_post_ra>
